<compile_context>
chip_gen: v6e
topology: v6e:2x2x1
jax: 0.10.0
libtpu: 0.0.40
codegen_flags: <defaults>
</compile_context>

<pallas_src>
import math

import jax
import jax.numpy as jnp
from jax.experimental import pallas as pl
from jax.experimental.pallas import tpu as pltpu


def _sumsq_kernel(mu_ref, x_ref, out_ref):
    """Accumulate per-lane partial sums of (x - mu)^2 into the resident output block."""
    t = pl.program_id(1)  # reduction axis (innermost, "arbitrary")

    @pl.when(t == 0)
    def _():
        out_ref[...] = jnp.zeros_like(out_ref)

    d = x_ref[...] - mu_ref[0, 0]                         # (tile_blk, 8, 128), VPU only
    out_ref[...] += (d * d).sum(axis=0, keepdims=True)    # (1, 8, 128) per-lane partials


def model_forward(xs, mu, scale_known, *, num_parallel=2, max_tile_rows=2048):
    """Forward of Model: constraint(=0) + Normal(mu, scale_known).log_prob(xs).sum().

    xs: (N,) f32 data vector, mu: (1,) f32 parameter, scale_known: python float.
    Works for any N (zero padding is corrected exactly in the wrapper).
    """
    n = int(xs.shape[0])
    xs = xs.astype(jnp.float32)
    mu = mu.astype(jnp.float32)

    # ---- tiling: large lane-dense blocks, capped for v7x VMEM (64 MiB) ----------
    rows_needed = -(-n // 128)                              # ceil(N / 128)
    P = max(1, int(num_parallel))                           # megacore split (v7x)
    tile_rows = -(-rows_needed // P)                        # rows per parallel slice
    tile_rows = min(max_tile_rows, max(8, ((tile_rows + 7) // 8) * 8))
    T = -(-rows_needed // (P * tile_rows))                  # reduction steps per slice
    total_rows = P * T * tile_rows
    pad_count = total_rows * 128 - n

    x_pad = jnp.pad(xs, (0, pad_count))                     # zero pad (corrected below)
    x3 = x_pad.reshape(total_rows // 8, 8, 128)             # (G, 8, 128), lane-dense
    mu_smem = mu.reshape(1, 1)

    tile_blk = tile_rows // 8                               # leading dim of data block

    out = pl.pallas_call(
        _sumsq_kernel,
        out_shape=jax.ShapeDtypeStruct((P, 8, 128), jnp.float32),
        grid_spec=pltpu.PrefetchScalarGridSpec(
            num_scalar_prefetch=0,
            grid=(P, T),
            in_specs=[
                pl.BlockSpec(memory_space=pltpu.MemorySpace.SMEM),         # mu scalar
                pl.BlockSpec((tile_blk, 8, 128),
                             lambda p, t: (p * T + t, 0, 0)),              # data blocks
            ],
            out_specs=pl.BlockSpec((1, 8, 128), lambda p, t: (p, 0, 0)),   # per-slice acc
        ),
        compiler_params=pltpu.CompilerParams(
            dimension_semantics=("parallel", "arbitrary"),
        ),
    )(mu_smem, x3)

    # ---- hoisted scalar math: scale factor, constant term, pad correction -------
    mu0 = mu[0]
    inv_scale = 1.0 / float(scale_known)
    neg_half_inv_var = -0.5 * inv_scale * inv_scale
    log_norm_const = -math.log(float(scale_known)) - 0.5 * math.log(2.0 * math.pi)

    ssq = jnp.sum(out) - pad_count * (mu0 * mu0)            # remove zero-pad contribution
    data_lp = neg_half_inv_var * ssq + n * log_norm_const
    constraint_contrib = jnp.float32(0.0)                   # Unconstrained: no constraint
    return constraint_contrib + data_lp


if __name__ == "__main__":
    key = jax.random.PRNGKey(0)

    # Deterministic parameter init (Unconstrained(1) -> single learnable scalar).
    mu = jnp.array([0.25], dtype=jnp.float32)
    scale_known = 1.5

    # Synthetic data: N = 2048 draws.
    N = 2048
    xs = jax.random.normal(key, (N,), dtype=jnp.float32) * scale_known + 0.1

    result = model_forward(xs, mu, scale_known)
    result = jax.block_until_ready(result)

    # Pure-JAX reference of the same forward pass.
    z = (xs - mu[0]) / scale_known
    ref = jnp.sum(-0.5 * z * z - jnp.log(scale_known) - 0.5 * jnp.log(2.0 * jnp.pi))
    assert jnp.allclose(result, ref, rtol=1e-5, atol=1e-3), (result, ref)

    print("KERNEL_OK")
</pallas_src>

<mosaic_0001>
module attributes {stable_mosaic.version = 11 : i64} {
  func.func @_sumsq_kernel(%arg0: i32, %arg1: i32, %arg2: memref<1x1xf32, #tpu.memory_space<smem>>, %arg3: memref<1x8x128xf32, #tpu.memory_space<vmem>>, %arg4: memref<1x8x128xf32, #tpu.memory_space<vmem>>) attributes {dimension_semantics = [#tpu.dimension_semantics<parallel>, #tpu.dimension_semantics<arbitrary>], iteration_bounds = array<i64: 2, 1>, scalar_prefetch = 0 : i64, scratch_operands = 0 : i64, tpu.core_type = #tpu.core_type<tc>, window_params = [{transform_indices = @transform_0, window_bounds = array<i64: 1, 1>}, {transform_indices = @transform_1, window_bounds = array<i64: 1, 8, 128>}, {transform_indices = @transform_2, window_bounds = array<i64: 1, 8, 128>}]} {
    %c0_i32 = arith.constant 0 : i32
    %0 = arith.cmpi eq, %arg1, %c0_i32 : i32
    %1 = arith.extui %0 : i1 to i32
    %c0_i32_0 = arith.constant 0 : i32
    %2 = arith.cmpi ne, %1, %c0_i32_0 : i32
    scf.if %2 {
      %cst_11 = arith.constant 0.000000e+00 : f32
      %13 = vector.broadcast %cst_11 : f32 to vector<1x8x128xf32>
      %c0_12 = arith.constant 0 : index
      %c0_13 = arith.constant 0 : index
      %c0_14 = arith.constant 0 : index
      %14 = vector.load %arg4[%c0_12, %c0_13, %c0_14] : memref<1x8x128xf32, #tpu.memory_space<vmem>>, vector<1x8x128xf32>
      tpu.vector_store %arg4[%c0_12, %c0_13, %c0_14], %13 {strides = array<i32>} : memref<1x8x128xf32, #tpu.memory_space<vmem>>, vector<1x8x128xf32>,
    } else {
    }
    %c0 = arith.constant 0 : index
    %c0_1 = arith.constant 0 : index
    %c0_2 = arith.constant 0 : index
    %3 = vector.load %arg3[%c0, %c0_1, %c0_2] : memref<1x8x128xf32, #tpu.memory_space<vmem>>, vector<1x8x128xf32>
    %c0_3 = arith.constant 0 : index
    %c0_4 = arith.constant 0 : index
    %4 = memref.load %arg2[%c0_3, %c0_4] : memref<1x1xf32, #tpu.memory_space<smem>>
    %5 = vector.broadcast %4 : f32 to vector<1x8x128xf32>
    %6 = arith.subf %3, %5 : vector<1x8x128xf32>
    %c0_5 = arith.constant 0 : index
    %c0_6 = arith.constant 0 : index
    %c0_7 = arith.constant 0 : index
    %7 = vector.load %arg4[%c0_5, %c0_6, %c0_7] : memref<1x8x128xf32, #tpu.memory_space<vmem>>, vector<1x8x128xf32>
    %8 = arith.mulf %6, %6 : vector<1x8x128xf32>
    %cst = arith.constant dense<0.000000e+00> : vector<8x128xf32>
    %9 = vector.multi_reduction <add>, %8, %cst [0] : vector<1x8x128xf32> to vector<8x128xf32>
    %10 = vector.shape_cast %9 : vector<8x128xf32> to vector<1x8x128xf32>
    %11 = arith.addf %7, %10 : vector<1x8x128xf32>
    %c0_8 = arith.constant 0 : index
    %c0_9 = arith.constant 0 : index
    %c0_10 = arith.constant 0 : index
    %12 = vector.load %arg4[%c0_8, %c0_9, %c0_10] : memref<1x8x128xf32, #tpu.memory_space<vmem>>, vector<1x8x128xf32>
    tpu.vector_store %arg4[%c0_8, %c0_9, %c0_10], %11 {strides = array<i32>} : memref<1x8x128xf32, #tpu.memory_space<vmem>>, vector<1x8x128xf32>,
    return
  }
  func.func @transform_0(%arg0: i32, %arg1: i32) -> (i32, i32) {
    %c0_i32 = arith.constant 0 : i32
    %c0_i32_0 = arith.constant 0 : i32
    %c0_i32_1 = arith.constant 0 : i32
    return %c0_i32, %c0_i32_0 : i32, i32
  }
  func.func @transform_1(%arg0: i32, %arg1: i32) -> (i32, i32, i32) {
    %c1_i32 = arith.constant 1 : i32
    %0 = arith.muli %arg0, %c1_i32 : i32
    %1 = arith.addi %0, %arg1 : i32
    %c0_i32 = arith.constant 0 : i32
    %c0_i32_0 = arith.constant 0 : i32
    %c0_i32_1 = arith.constant 0 : i32
    return %1, %c0_i32, %c0_i32_0 : i32, i32, i32
  }
  func.func @transform_2(%arg0: i32, %arg1: i32) -> (i32, i32, i32) {
    %c0_i32 = arith.constant 0 : i32
    %c0_i32_0 = arith.constant 0 : i32
    %c0_i32_1 = arith.constant 0 : i32
    return %arg0, %c0_i32, %c0_i32_0 : i32, i32, i32
  }
}

</mosaic_0001>

<bundles_post_ra>
// kernel: tpu_custom_call.1
= control target key start
LH: loop header
LB: loop body
LE: loop exit
PB: predicated region body
PF: predicated region fallthrough
CT: control target
= control target key end

     0   :  { %s623_s0 = inlined_call_operand.<no memory space> [shape: f32[1,1], index: 0, kind: input, shape index: {}]   ;;  %s624_s1 = inlined_call_operand.hbm [shape: f32[2,8,128], index: 1, kind: input, shape index: {}]   ;;  %s625_s2 = inlined_call_operand.hbm [shape: f32[2,8,128], index: 2, kind: output, shape index: {}]  }
   0x1   :  { %7 = sst [smem:[#allocation2]] %s623_s0 }
   0x2   :  { %8 = vsyncpa [#allocation4], 0 }
   0x3   :  { %10 = vsyncpa [#allocation4 + $0x1], 0 }
   0x4   :  { %11 = vsyncpa [#allocation5], 0 }
   0x5   :  { %13 = vsyncpa [#allocation5 + $0x1], 0  ;;  %s489_s11 = smov 0   ;;  %s491_s12 = smov 0  }
   0x6   :  { %s493_s13 = smov 0   ;;  %s495_s14 = smov 0  }
   0x7   :  { %s497_s15 = smov 0   ;;  %s499_s16 = smov 0  }
   0x8 LB: > { %s283_s0 = sadd.s32 4294967295, %s467_s16   ;;  %s284_s17 = sadd.s32 4294967294, %s467_s16   ;;  %s467_s16 = sphi %s499_s16, %s19_s16   ;;  %s463_s15 = sphi %s497_s15, %s637_s15   ;;  %s459_s14 = sphi %s495_s14, %s636_s14   ;;  %s455_s13 = sphi %s493_s13, %s635_s13   ;;  %s451_s12 = sphi %s491_s12, %s634_s12   ;;  %s447_s11 = sphi %s489_s11, %s633_s11  }
   0x9   : > { %s31_s18 = sadd.s32 1, %s463_s15  ;;  %s61_s19 = sadd.s32 1, %s455_s13 }
   0xa   : > { %p33_p0 = scmp.ge.s32.totalorder %s31_s18, 2  ;;  %p68_p1 = scmp.ne.s32.totalorder %s455_s13, %s451_s12 }
   0xb   : > { %p69_p2 = scmp.eq.s32.totalorder %s467_s16, 0  ;;  %p74_p3 = scmp.ne.s32.totalorder %s451_s12, %s447_s11 }
   0xc   : > { %s639_s18 = smov (%p33_p0, %s31_s18), 0  ;;  %p75_p5 = scmp.eq.s32.totalorder %s283_s0, 0 }
   0xd   : > { %p530_p4 = por %p69_p2, %p68_p1  ;;  %s58_s21 = ssub.s32 %s463_s15, %s639_s18 }
   0xe   : > { %p98_p6 = scmp.eq.s32.totalorder %s283_s0, 1  ;;  %p59_p7 = scmp.eq.s32.totalorder %s58_s21, 0 }
   0xf   : > { %p536_p8 = por %p75_p5, %p74_p3  ;;  %p104_p10 = scmp.eq.s32.totalorder %s284_s17, 1 }
  0x10   : > { %p540_p9 = por %p98_p6, %p68_p1  ;;  %p308_p13 = scmp.lt.s32.totalorder %s467_s16, 2 }
  0x11   : > { %s545_s24 = scalar_select %p59_p7, %s455_s13, %s61_s19  }
  0x12   : > { %p547_p11 = por %p104_p10, %p74_p3  ;;  %s127_s26 = sand.u32 1, %s455_s13  }
  0x13   : > { %s287_s27 = sshll.u32 %s127_s26, 3  ;;  %s288_s28 = sshll.u32 %s463_s15, 7 }
  0x14   : > { %s629_s25 = scalar_select %p547_p11, 1, 0 }
  0x15   : > { %s137_s3 = scalar_lea.hbm %s624_s1, %s288_s28  ;;  %s131_s4 = scalar_lea.vmem [#allocation3], %s287_s27 }
  0x16   : > { %s139_s5 = sshll.u32 %s131_s4, 4  ;;  %p560_p0 = pnand %p308_p13, %p530_p4  ;;  %s140_s5 = int_to_ptr.vmem [resolvable:$true] %s139_s5 }
  0x17   : > { %p289_p1 = scmp.ge.s32.totalorder %s467_s16, 1  ;;  %p144_p2 = scmp.lt.s32.totalorder %s467_s16, 3 }
  0x18   : > { %s128_s7 = scalar_lea.sflag [#allocation4], %s127_s26  ;;  %p361_p3 = pneg %p560_p0 }
  0x19   : > { %s372_s8 = scalar_lea.vmem %s140_s5, 128  ;;  %s469_s9 = smov [#allocation3]  }
  0x1a   : > { %p373_p5 = scmp.ne.s32.totalorder %s140_s5, %s372_s8  ;;  %s377_s10 = sshll.u32 %s469_s9, 4  ;;  %s378_s10 = int_to_ptr.vmem [resolvable:$false] %s377_s10 }
  0x1b   : > { %s379_s0 = scalar_lea.vmem %s378_s10, 256  ;;  %p380_p10 = scmp.lt.s32.totalorder %s140_s5, %s378_s10 }
  0x1c   : > { %p375_p6 = pnand %p373_p5, %p361_p3  ;;  %p381_p12 = scmp.lt.s32.totalorder %s379_s0, %s372_s8 }
  0x1e   : > { %p376_p7 = pneg %p375_p6  ;;  %p382_p4 = por %p381_p12, %p380_p10 }
  0x20   : > { %p383_p13 = pnand %p382_p4, %p376_p7 }
  0x22   : > { %386 = shalt.err (!%p383_p13)
}
  0x23   : > { %303 = dma.hbm_to_vmem [thread:$0]  (!%p560_p0), %s137_s3, 128, %s140_s5, %s128_s7  }
  0x24   : > { %p145_p11 = pnand %p289_p1, %p144_p2 }
  0x25   : > { %s575_s17 = sand.u32 (!%p145_p11), 1, %s451_s12  }
  0x26   : > { %148 = sbr.rel (%p145_p11) target bundleno = 68 (0x44), region = 28  ;;  %s290_s19 = sshll.u32 (!%p145_p11), %s575_s17, 3 }
  0x27   : > { %s151_s20 = scalar_lea.sflag (!%p145_p11), [#allocation4], %s575_s17  ;;  %s154_s21 = scalar_lea.vmem (!%p145_p11), [#allocation3], %s290_s19 }
  0x2b   : > { %438 = dma.done.wait (%p536_p8), %s151_s20, 128  }
  0x2c   : > { %440 = vsyncadd (%p536_p8), %s151_s20, 4294967168  ;;  %s182_s26 = sld [smem:[#allocation2]]  ;;  %v181_v1 = vld [vmem:[%s154_s21] sm:$0xff]  ;;  %s293_s27 = sshll.u32 %s459_s14, 7 }
  0x2d   : > { %s174_s28 = scalar_lea.vmem [#allocation6], %s290_s19  ;;  %s202_s4 = scalar_lea.hbm %s625_s2, %s293_s27 }
  0x2e   : > { %s204_s29 = sshll.u32 %s174_s28, 4  ;;  %s191_s5 = scalar_lea.sflag [#allocation5], %s575_s17  ;;  %s205_s29 = int_to_ptr.vmem [resolvable:$true] %s204_s29 }
  0x2f   : > { %s387_s22 = scalar_lea.vmem %s205_s29, 128  ;;  %s470_s6 = smov [#allocation6]  }
  0x30   : > { %p388_p8 = scmp.ne.s32.totalorder %s205_s29, %s387_s22  ;;  %s391_s7 = sshll.u32 %s470_s6, 4  ;;  %s392_s7 = int_to_ptr.vmem [resolvable:$false] %s391_s7 }
  0x31   : > { %s393_s8 = scalar_lea.vmem %s392_s7, 256  ;;  %p394_p0 = scmp.lt.s32.totalorder %s205_s29, %s392_s7 }
  0x32   : > { %v183_v0 = vstv %s182_s26  ;;  %p389_p11 = pnand %p388_p8, %p540_p9  ;;  %p395_p1 = scmp.lt.s32.totalorder %s393_s8, %s387_s22 }
  0x33   : > { %v184_v2 = vsub.f32 %v181_v1, %v183_v0 }
  0x34   : > { %p390_p12 = pneg %p389_p11  ;;  %p396_p2 = por %p395_p1, %p394_p0 }
  0x35   : > { %v186_v3 = vmul.f32 %v184_v2, %v184_v2 }
  0x36   : > { %p397_p3 = pnand %p396_p2, %p390_p12 }
  0x37   : > { %189 = vst [vmem:[%s174_s28] sm:$0xff] %v186_v3 }
  0x38   : > { %400 = shalt.err (!%p397_p3)
}
  0x39   : > { %s401_s14 = scalar_lea.hbm %s202_s4, 128  ;;  %s405_s0 = scalar_lea.hbm %s625_s2, 256 }
  0x3a   : > { %p402_p5 = scmp.ne.s32.totalorder %s202_s4, %s401_s14  ;;  %p406_p10 = scmp.lt.s32.totalorder %s202_s4, %s625_s2 }
  0x3b   : > { %p407_p4 = scmp.lt.s32.totalorder %s405_s0, %s401_s14 }
  0x3c   : > { %p403_p6 = pnand %p402_p5, %p540_p9 }
  0x3d   : > { %p408_p13 = por %p407_p4, %p406_p10 }
  0x3e   : > { %p404_p7 = pneg %p403_p6 }
  0x40   : > { %p409_p8 = pnand %p408_p13, %p404_p7 }
  0x42   : > { %412 = shalt.err (!%p409_p8)
}
  0x43   : > { %298 = dma.vmem_to_hbm [thread:$0]  (%p540_p9), %s205_s29, 128, %s202_s4, %s191_s5  }
  0x44 PF: > { %s216_s20 = sand.u32 1, %s447_s11   ;;  %p631_p11 = scmp.ne.s32.totalorder %s629_s25, 0 }
  0x45   : > { %p632_p12 = scmp.ge.s32.totalorder %s467_s16, 2  ;;  %s217_s21 = scalar_lea.sflag [#allocation5], %s216_s20 }
  0x47   : > { %p305_p0 = pnand %p632_p12, %p631_p11 }
  0x49   : > { %p306_p1 = pneg %p305_p0 }
  0x4b   : > { %442 = dma.done.wait (%p306_p1), %s217_s21, 128  }
  0x4c   : > { %444 = vsyncadd (%p306_p1), %s217_s21, 4294967168  ;;  %s19_s16 = sadd.s32 1, %s467_s16   ;;  %s633_s11 = smov %s451_s12 }
  0x4d   : > { %p16_p2 = scmp.ge.s32.totalorder %s19_s16, 4   ;;  %s634_s12 = smov %s455_s13 }
  0x4e   : > { %s635_s13 = smov %s545_s24  ;;  %s636_s14 = smov %s463_s15 }
  0x4f   : > { %s637_s15 = smov %s639_s18  ;;  %18 = sbr.rel (!%p16_p2) target bundleno = 8 (0x8), region = 77 }
  0x54   :  { %222 = vsyncpa [#allocation4], 1 }
  0x55   :  { %224 = vsyncpa [#allocation4 + $0x1], 1 }
  0x56   :  { %225 = vsyncpa [#allocation5], 1 }
  0x57   :  { %227 = vsyncpa [#allocation5 + $0x1], 1 }

</bundles_post_ra>
